<compile_context>
chip_gen: v7x
topology: tpu7x:2x2x1
jax: 0.10.0
libtpu: 0.0.40
codegen_flags: <defaults>
</compile_context>

<pallas_src>
import jax
import jax.numpy as jnp
from jax.experimental import pallas as pl
from jax.experimental.pallas import tpu as pltpu

FEATURE_DIM = 64                                   # self.feature_dim = 64
N_CLASS = 50                                       # stand-in for len(AUDIOSET_TAGS)
DROPOUT_P = 0.1                                    # nn.Dropout(0.1)
DROP_THRESHOLD = int(round(DROPOUT_P * (2 ** 32))) # drop iff hash < p * 2^32 (rounded, not truncated)
NEG_INF = -1.0e30                                  # padded-class logit value (exp underflows to 0)


def music_head_kernel(seed_ref, cls_ref, y_ref, w_ref, b_ref, loss_ref):
    bt, d = cls_ref.shape

    # ---- feature = self.to_latent(feature[:, 0]) (CLS slab already sliced) ----
    cls = cls_ref[...].astype(jnp.float32)                       # [Bt, D]

    # ---- feature = self.dropout(feature)  (training-mode inverted dropout) ----
    # Counter-based hash PRNG (lowbias32 finalizer): portable across real TPU and
    # interpret mode (pltpu.prng_seed has no CPU-interpret lowering).
    row = jax.lax.broadcasted_iota(jnp.int32, (bt, d), 0)
    col = jax.lax.broadcasted_iota(jnp.int32, (bt, d), 1)
    tile_off = (pl.program_id(0) * (bt * d)).astype(jnp.uint32)
    seed_mix = seed_ref[0].astype(jnp.uint32) * jnp.uint32(0x9E3779B9)
    x = (row * d + col).astype(jnp.uint32) + tile_off + seed_mix
    x = (x ^ (x >> 16)) * jnp.uint32(0x7FEB352D)
    x = (x ^ (x >> 15)) * jnp.uint32(0x846CA68B)
    x = x ^ (x >> 16)
    keep = x >= jnp.uint32(DROP_THRESHOLD)
    cls = jnp.where(keep, cls * jnp.float32(1.0 / (1.0 - DROPOUT_P)), jnp.float32(0.0))

    # ---- logit = self.mlp_head(feature)  (Linear: x @ W^T + b, C padded to 128) ----
    logits = jnp.dot(cls, w_ref[...], preferred_element_type=jnp.float32)
    logits = logits + b_ref[...]                                 # [Bt, C_PAD]; pad cols = -1e30

    # ---- loss = self.loss_fn(logit, y)  (CrossEntropyLoss, per-example) ----
    m = jnp.max(logits, axis=-1, keepdims=True)                  # [Bt, 1]
    lse = m + jnp.log(jnp.sum(jnp.exp(logits - m), axis=-1, keepdims=True))
    class_idx = jax.lax.broadcasted_iota(jnp.int32, logits.shape, 1)
    picked = jnp.sum(jnp.where(class_idx == y_ref[...], logits, jnp.float32(0.0)),
                     axis=-1, keepdims=True)                     # [Bt, 1]
    loss_ref[...] = lse - picked                                 # per-example CE


def music_model_loss(feat, y, weight, bias, *, seed=0):
    """MusicModel.forward head.

    feat:   [B, S, D] feature_extractor output (f32 or bf16)
    y:      [B] int class labels
    weight: [C, D] nn.Linear weight (torch layout)
    bias:   [C]    nn.Linear bias
    Returns scalar mean cross-entropy loss.
    NOTE: pass a different `seed` every training step for fresh dropout masks.
    """
    B, S, D = feat.shape
    C = weight.shape[0]
    C_PAD = max(128, ((C + 127) // 128) * 128)   # lane-dense class dim

    # CLS-token selection in the wrapper: only B*D elements ever reach the kernel.
    cls = feat[:, 0, :]                          # [B, D], keeps feat's dtype (cast in-kernel)

    # Batch tiling (<=512 rows per grid step; pad B so it divides evenly).
    if B <= 512:
        b_tile, b_pad = B, B
    else:
        b_tile = 512
        b_pad = ((B + b_tile - 1) // b_tile) * b_tile
    if b_pad != B:
        cls = jnp.pad(cls, ((0, b_pad - B), (0, 0)))
        y = jnp.pad(y, (0, b_pad - B))
    num_tiles = b_pad // b_tile

    # Pre-transpose weight to [D, C_PAD] (zero pad); pad bias columns with -1e30 so
    # padded logits never affect max / log-sum-exp.
    w_t = jnp.zeros((D, C_PAD), jnp.float32).at[:, :C].set(weight.T.astype(jnp.float32))
    b_pad_arr = jnp.full((1, C_PAD), NEG_INF, jnp.float32).at[0, :C].set(bias.astype(jnp.float32))
    y2 = y.reshape(b_pad, 1).astype(jnp.int32)
    seed_arr = jnp.asarray([seed], dtype=jnp.int32)

    grid_spec = pltpu.PrefetchScalarGridSpec(
        num_scalar_prefetch=1,                    # seed -> SMEM
        grid=(num_tiles,),
        in_specs=[
            pl.BlockSpec((b_tile, D), lambda i, s: (i, 0)),       # cls slab
            pl.BlockSpec((b_tile, 1), lambda i, s: (i, 0)),       # labels
            pl.BlockSpec((D, C_PAD), lambda i, s: (0, 0)),        # weight (resident)
            pl.BlockSpec((1, C_PAD), lambda i, s: (0, 0)),        # bias   (resident)
        ],
        out_specs=pl.BlockSpec((b_tile, 1), lambda i, s: (i, 0)), # per-example loss
    )

    itemsize = jnp.dtype(cls.dtype).itemsize
    per_example = pl.pallas_call(
        music_head_kernel,
        out_shape=jax.ShapeDtypeStruct((b_pad, 1), jnp.float32),
        grid_spec=grid_spec,
        compiler_params=pltpu.CompilerParams(
            dimension_semantics=("parallel",),    # batch tiles are independent (2 TCs on v7x)
        ),
        cost_estimate=pl.CostEstimate(
            flops=2 * b_pad * D * C_PAD,
            transcendentals=b_pad * C_PAD,
            bytes_accessed=b_pad * D * itemsize + D * C_PAD * 4 + C_PAD * 4
                           + b_pad * 4 + b_pad * 4,
        ),
    )(seed_arr, cls, y2, w_t, b_pad_arr)

    # CrossEntropyLoss(reduction="mean") over the real batch only.
    return jnp.mean(per_example[:B, 0])


if __name__ == "__main__":
    key = jax.random.PRNGKey(0)
    kf, ky, kw, kb = jax.random.split(key, 4)

    B, S, D, C = 2, 8, FEATURE_DIM, N_CLASS

    # TODO(synk): the MusicTaggingTransformer feature_extractor (loaded from a
    # pretrained .pt checkpoint) has no in-script definition; `feat` stands in
    # for feature_extractor(x)'s token-sequence output [B, S, 64].
    feat = jax.random.normal(kf, (B, S, D), dtype=jnp.float32)
    y = jax.random.randint(ky, (B,), 0, C)

    # mlp_head params in torch nn.Linear layout (C, D) / (C,).
    bound = 1.0 / (D ** 0.5)
    weight = jax.random.uniform(kw, (C, D), minval=-bound, maxval=bound, dtype=jnp.float32)
    bias = jax.random.uniform(kb, (C,), minval=-bound, maxval=bound, dtype=jnp.float32)

    loss = music_model_loss(feat, y, weight, bias, seed=0)
    jax.block_until_ready(loss)
    print("KERNEL_OK")
</pallas_src>

<mosaic_0001>
module attributes {stable_mosaic.version = 11 : i64} {
  func.func @music_head_kernel(%arg0: i32, %arg1: memref<1xi32, #tpu.memory_space<smem>>, %arg2: memref<2x64xf32, #tpu.memory_space<vmem>>, %arg3: memref<2x1xi32, #tpu.memory_space<vmem>>, %arg4: memref<64x128xf32, #tpu.memory_space<vmem>>, %arg5: memref<1x128xf32, #tpu.memory_space<vmem>>, %arg6: memref<2x1xf32, #tpu.memory_space<vmem>>) attributes {dimension_semantics = [#tpu.dimension_semantics<parallel>], iteration_bounds = array<i64: 1>, scalar_prefetch = 1 : i64, scratch_operands = 0 : i64, tpu.core_type = #tpu.core_type<tc>, window_params = [{transform_indices = @transform_0, window_bounds = array<i64: 2, 64>}, {transform_indices = @transform_1, window_bounds = array<i64: 2, 1>}, {pipeline_mode = #tpu.pipeline_mode<synchronous>, transform_indices = @transform_2, window_bounds = array<i64: 64, 128>}, {pipeline_mode = #tpu.pipeline_mode<synchronous>, transform_indices = @transform_3, window_bounds = array<i64: 1, 128>}, {transform_indices = @transform_4, window_bounds = array<i64: 2, 1>}]} {
    %c0 = arith.constant 0 : index
    %c0_0 = arith.constant 0 : index
    %0 = vector.load %arg2[%c0, %c0_0] : memref<2x64xf32, #tpu.memory_space<vmem>>, vector<2x64xf32>
    %1 = tpu.iota {dimensions = array<i32: 0>} : vector<2x64xi32>
    %2 = tpu.iota {dimensions = array<i32: 1>} : vector<2x64xi32>
    %c128_i32 = arith.constant 128 : i32
    %3 = arith.muli %arg0, %c128_i32 : i32
    %c0_1 = arith.constant 0 : index
    %4 = memref.load %arg1[%c0_1] : memref<1xi32, #tpu.memory_space<smem>>
    %c-1640531527_i32 = arith.constant -1640531527 : i32
    %5 = arith.muli %4, %c-1640531527_i32 : i32
    %c64_i32 = arith.constant 64 : i32
    %6 = vector.broadcast %c64_i32 : i32 to vector<2x64xi32>
    %7 = arith.muli %1, %6 : vector<2x64xi32>
    %8 = arith.addi %7, %2 : vector<2x64xi32>
    %9 = vector.broadcast %3 : i32 to vector<2x64xi32>
    %10 = arith.addi %8, %9 : vector<2x64xi32>
    %11 = vector.broadcast %5 : i32 to vector<2x64xi32>
    %12 = arith.addi %10, %11 : vector<2x64xi32>
    %c16_i32 = arith.constant 16 : i32
    %13 = vector.broadcast %c16_i32 : i32 to vector<2x64xi32>
    %14 = arith.shrui %12, %13 : vector<2x64xi32>
    %15 = arith.xori %12, %14 : vector<2x64xi32>
    %c2146121005_i32 = arith.constant 2146121005 : i32
    %16 = vector.broadcast %c2146121005_i32 : i32 to vector<2x64xi32>
    %17 = arith.muli %15, %16 : vector<2x64xi32>
    %c15_i32 = arith.constant 15 : i32
    %18 = vector.broadcast %c15_i32 : i32 to vector<2x64xi32>
    %19 = arith.shrui %17, %18 : vector<2x64xi32>
    %20 = arith.xori %17, %19 : vector<2x64xi32>
    %c-2073254261_i32 = arith.constant -2073254261 : i32
    %21 = vector.broadcast %c-2073254261_i32 : i32 to vector<2x64xi32>
    %22 = arith.muli %20, %21 : vector<2x64xi32>
    %c16_i32_2 = arith.constant 16 : i32
    %23 = vector.broadcast %c16_i32_2 : i32 to vector<2x64xi32>
    %24 = arith.shrui %22, %23 : vector<2x64xi32>
    %25 = arith.xori %22, %24 : vector<2x64xi32>
    %c429496730_i32 = arith.constant 429496730 : i32
    %26 = vector.broadcast %c429496730_i32 : i32 to vector<2x64xi32>
    %27 = arith.cmpi uge, %25, %26 : vector<2x64xi32>
    %cst = arith.constant 1.11111116 : f32
    %28 = vector.broadcast %cst : f32 to vector<2x64xf32>
    %29 = arith.mulf %0, %28 : vector<2x64xf32>
    %cst_3 = arith.constant 0.000000e+00 : f32
    %30 = vector.broadcast %cst_3 : f32 to vector<2x64xf32>
    %31 = arith.select %27, %29, %30 : vector<2x64xi1>, vector<2x64xf32>
    %c0_4 = arith.constant 0 : index
    %c0_5 = arith.constant 0 : index
    %32 = vector.load %arg4[%c0_4, %c0_5] : memref<64x128xf32, #tpu.memory_space<vmem>>, vector<64x128xf32>
    %cst_6 = arith.constant dense<0.000000e+00> : vector<2x128xf32>
    %33 = tpu.matmul %31, %32, %cst_6 {dimension_numbers = #tpu.dot_dimension_numbers<[1], [0], [0], [1], [0, 0, 1, 1], [], []>} : vector<2x64xf32>, vector<64x128xf32>, vector<2x128xf32> -> vector<2x128xf32>
    %c0_7 = arith.constant 0 : index
    %c0_8 = arith.constant 0 : index
    %34 = vector.load %arg5[%c0_7, %c0_8] : memref<1x128xf32, #tpu.memory_space<vmem>>, vector<1x128xf32>
    %35 = vector.broadcast %34 : vector<1x128xf32> to vector<2x128xf32>
    %36 = arith.addf %33, %35 : vector<2x128xf32>
    %cst_9 = arith.constant dense<0xFF800000> : vector<2xf32>
    %37 = vector.multi_reduction <maximumf>, %36, %cst_9 [1] : vector<2x128xf32> to vector<2xf32>
    %38 = vector.shape_cast %37 : vector<2xf32> to vector<2x1xf32>
    %39 = vector.broadcast %38 : vector<2x1xf32> to vector<2x128xf32>
    %40 = arith.subf %36, %39 : vector<2x128xf32>
    %41 = math.exp %40 : vector<2x128xf32>
    %cst_10 = arith.constant dense<0.000000e+00> : vector<2xf32>
    %42 = vector.multi_reduction <add>, %41, %cst_10 [1] : vector<2x128xf32> to vector<2xf32>
    %43 = vector.shape_cast %42 : vector<2xf32> to vector<2x1xf32>
    %44 = math.log %43 : vector<2x1xf32>
    %45 = arith.addf %38, %44 : vector<2x1xf32>
    %46 = tpu.iota {dimensions = array<i32: 1>} : vector<2x128xi32>
    %c0_11 = arith.constant 0 : index
    %c0_12 = arith.constant 0 : index
    %47 = vector.load %arg3[%c0_11, %c0_12] : memref<2x1xi32, #tpu.memory_space<vmem>>, vector<2x1xi32>
    %48 = vector.broadcast %47 : vector<2x1xi32> to vector<2x128xi32>
    %49 = arith.cmpi eq, %46, %48 : vector<2x128xi32>
    %cst_13 = arith.constant 0.000000e+00 : f32
    %50 = vector.broadcast %cst_13 : f32 to vector<2x128xf32>
    %51 = arith.select %49, %36, %50 : vector<2x128xi1>, vector<2x128xf32>
    %cst_14 = arith.constant dense<0.000000e+00> : vector<2xf32>
    %52 = vector.multi_reduction <add>, %51, %cst_14 [1] : vector<2x128xf32> to vector<2xf32>
    %53 = vector.shape_cast %52 : vector<2xf32> to vector<2x1xf32>
    %54 = arith.subf %45, %53 : vector<2x1xf32>
    %c0_15 = arith.constant 0 : index
    %c0_16 = arith.constant 0 : index
    %55 = vector.load %arg6[%c0_15, %c0_16] : memref<2x1xf32, #tpu.memory_space<vmem>>, vector<2x1xf32>
    tpu.vector_store %arg6[%c0_15, %c0_16], %54 {strides = array<i32>} : memref<2x1xf32, #tpu.memory_space<vmem>>, vector<2x1xf32>,
    return
  }
  func.func @transform_0(%arg0: i32, %arg1: memref<1xi32, #tpu.memory_space<smem>>) -> (i32, i32) {
    %c0_i32 = arith.constant 0 : i32
    %c0_i32_0 = arith.constant 0 : i32
    return %arg0, %c0_i32 : i32, i32
  }
  func.func @transform_1(%arg0: i32, %arg1: memref<1xi32, #tpu.memory_space<smem>>) -> (i32, i32) {
    %c0_i32 = arith.constant 0 : i32
    %c0_i32_0 = arith.constant 0 : i32
    return %arg0, %c0_i32 : i32, i32
  }
  func.func @transform_2(%arg0: i32, %arg1: memref<1xi32, #tpu.memory_space<smem>>) -> (i32, i32) {
    %c0_i32 = arith.constant 0 : i32
    %c0_i32_0 = arith.constant 0 : i32
    %c0_i32_1 = arith.constant 0 : i32
    return %c0_i32, %c0_i32_0 : i32, i32
  }
  func.func @transform_3(%arg0: i32, %arg1: memref<1xi32, #tpu.memory_space<smem>>) -> (i32, i32) {
    %c0_i32 = arith.constant 0 : i32
    %c0_i32_0 = arith.constant 0 : i32
    %c0_i32_1 = arith.constant 0 : i32
    return %c0_i32, %c0_i32_0 : i32, i32
  }
  func.func @transform_4(%arg0: i32, %arg1: memref<1xi32, #tpu.memory_space<smem>>) -> (i32, i32) {
    %c0_i32 = arith.constant 0 : i32
    %c0_i32_0 = arith.constant 0 : i32
    return %arg0, %c0_i32 : i32, i32
  }
}

</mosaic_0001>

<bundles_post_ra>
// kernel: tpu_custom_call.1
= control target key start
LH: loop header
LB: loop body
LE: loop exit
PB: predicated region body
PF: predicated region fallthrough
CT: control target
= control target key end

     0   :  { %11 = vsyncpa [#allocation5], 0  ;;  %s255_s18 = smov [#allocation4]   ;;  %s322_s0 = inlined_call_operand.<no memory space> [shape: s32[1], index: 0, kind: input, shape index: {}]   ;;  %s323_s1 = inlined_call_operand.vmem [shape: f32[2,64], index: 1, kind: input, shape index: {}]   ;;  %s324_s2 = inlined_call_operand.vmem [shape: s32[2,1], index: 2, kind: input, shape index: {}]   ;;  %s325_s3 = inlined_call_operand.hbm [shape: f32[64,128], index: 3, kind: input, shape index: {}]   ;;  %s326_s4 = inlined_call_operand.vmem [shape: f32[1,128], index: 4, kind: input, shape index: {}]   ;;  %s327_s5 = inlined_call_operand.vmem [shape: f32[2,1], index: 5, kind: output, shape index: {}]  }
   0x1   :  { %s21_s19 = sshll.u32 %s255_s18, 4  ;;  %s231_s22 = scalar_lea.hbm %s325_s3, 1024  ;;  %s22_s19 = int_to_ptr.vmem [resolvable:$true] %s21_s19 }
   0x2   :  { %p232_p0 = scmp.ne.s32.totalorder %s325_s3, %s231_s22  ;;  %p235_p1 = scmp.lt.u32.totalorder %s231_s22, %s325_s3 }
   0x4   :  { %p237_p2 = pnand %p235_p1, %p232_p0 }
   0x6   :  { %240 = shalt.err (!%p237_p2)
}
   0x7   :  { %s241_s27 = scalar_lea.vmem %s22_s19, 1024  ;;  %p246_p4 = scmp.lt.s32.totalorder %s22_s19, %s22_s19 }
   0x8   :  { %p242_p3 = scmp.ne.s32.totalorder %s22_s19, %s241_s27  ;;  %p247_p5 = scmp.lt.s32.totalorder %s241_s27, %s241_s27 }
   0xa   :  { %p248_p6 = por %p247_p5, %p246_p4 }
   0xc   :  { %p249_p7 = pnand %p248_p6, %p242_p3 }
   0xe   :  { %252 = shalt.err (!%p249_p7)
}
   0xf   :  { %s256_s28 = smov 128   ;;  %s257_s29 = smov 8  }
  0x10   :  { %27 = dma.hbm_to_vmem [thread:$0]  %s325_s3, 1024, %s22_s19, [#allocation5], %s256_s28, %s256_s28, %s257_s29  }
  0x11   :  { %253 = dma.done.wait [#allocation5], 1024  }
  0x12   :  { %254 = vsyncadd [#allocation5], 4294966272  ;;  %v34_v0 = vlaneseq  ;;  %v258_v1 = vmov 0.0|0.0   ;;  %vm259_vm0 = vmmov 0   ;;  %v260_v2 = vmov 0.0   ;;  %v58_v8 = vld [vmem:[#allocation4] sm:$0xff] }
  0x13   :  { %207 = vmatprep.subr.bf16.mxu0 %v258_v1  ;;  %204 = vmatprep.mubr.msk.f32.mxu0 %vm259_vm0, %v260_v2  ;;  %s40_s9 = smul.u32 2654435769, %s322_s0  ;;  %v59_v9 = vld [vmem:[#allocation4 + $0x8] sm:$0xff]  ;;  %v60_v10 = vld [vmem:[#allocation4 + $0x10] sm:$0xff]  ;;  %v61_v12 = vld [vmem:[#allocation4 + $0x18] sm:$0xff]  ;;  %vm73_vm1 = vcmask 523264  }
  0x14   :  { %v35_v3 = vshrl.u32 %v34_v0, 7  ;;  %v37_v4 = vand.u32 127, %v34_v0  ;;  %v208_v11 = vpack.c.bf16 %v59_v9, %v58_v8  ;;  %v211_v14 = vpack.c.bf16 %v61_v12, %v60_v10  ;;  %v62_v16 = vld [vmem:[#allocation4 + $0x20] sm:$0xff]  ;;  %v63_v17 = vld [vmem:[#allocation4 + $0x28] sm:$0xff]  ;;  %v64_v21 = vld [vmem:[#allocation4 + $0x30] sm:$0xff] }
  0x15   :  { %v45_v6 = vstv %s40_s9  ;;  %v214_v19 = vpack.c.bf16 %v63_v17, %v62_v16  ;;  %v65_v22 = vld [vmem:[#allocation4 + $0x38] sm:$0xff]  ;;  %v33_v26 = vld [vmem:[%s323_s1] sm:$0x3]  ;;  %v261_v32 = vmov 0   ;;  %vm147_vm3 = vcmask 1041408  }
  0x16   :  { %v41_v5 = vmul.u32 64, %v35_v3  ;;  %209 = vmatpush3.bf16.msra.mxu0 %v208_v11  ;;  %v217_v24 = vpack.c.bf16 %v65_v22, %v64_v21  ;;  %v56_v29 = vmul.f32 1.1111112, %v33_v26  ;;  %226 = vset.pattern.permute.xlu0 %v261_v32  ;;  %v177_v33 = vld [vmem:[%s326_s4] ss:$0 sm:$0xff]  ;;  %vm170_vm5 = vcmask 1024  }
  0x17   :  { %210 = vmatprep.subr.bf16.mxu0 %v258_v1  ;;  %v160_v38 = vld [vmem:[%s324_s2] sm:$0x3] }
  0x18   :  { %v42_v7 = vadd.s32 %v41_v5, %v37_v4 }
  0x1a   :  { %v46_v13 = vadd.s32 %v45_v6, %v42_v7  ;;  %212 = vmatpush3.bf16.msra.mxu0 %v211_v14 }
  0x1b   :  { %213 = vmatprep.subr.bf16.mxu0 %v258_v1 }
  0x1c   :  { %v47_v15 = vshrl.u32 %v46_v13, 16 }
  0x1e   :  { %v48_v18 = vxor.u32 %v47_v15, %v46_v13  ;;  %215 = vmatpush3.bf16.msra.mxu0 %v214_v19 }
  0x1f   :  { %216 = vmatprep.subr.bf16.mxu0 %v258_v1 }
  0x20   :  { %v49_v20 = vmul.u32 2146121005, %v48_v18 }
  0x22   :  { %v50_v23 = vshrl.u32 %v49_v20, 15  ;;  %218 = vmatpush3.bf16.msra.mxu0 %v217_v24 }
  0x24   :  { %v51_v25 = vxor.u32 %v50_v23, %v49_v20 }
  0x26   :  { %v52_v27 = vmul.u32 2221713035, %v51_v25 }
  0x28   :  { %v53_v28 = vshrl.u32 %v52_v27, 16 }
  0x2a   :  { %v54_v30 = vxor.u32 %v53_v28, %v52_v27 }
  0x2c   :  { %vm55_vm2 = vcmp.ge.u32.totalorder %v54_v30, 429496730 }
  0x2d   :  { %v57_v31 = vsel %vm55_vm2, %v56_v29, 0.0 }
  0x2e   :  { %205 = vmatmul.mubr.msk.f32.vlgmr.msra.gmra.mrb[0].mxu0 %vm73_vm1, %v57_v31 }
 0x101   :  { %v143_v34 = vpop.f32.mrb[0].mxu0 }
 0x102   :  { %v144_v35 = vadd.f32 %v177_v33, %v143_v34  ;;  %v206_v36 = vpop.f32.mrb[1].mxu0 }
 0x104   :  { %v148_v37 = vsel %vm147_vm3, %v144_v35, -inf }
 0x105   :  { %149 = vmax.xlane.f32.xlu0 %v148_v37 }
 0x11b   :  { %162 = vperm.xlu0 %226, %v160_v38  }
 0x192   :  { %v150_v39 = vpop.xlane.xlu0 %149 }
 0x193   :  { %v151_v40 = vsub.f32 %v144_v35, %v150_v39 }
 0x195   :  { %v152_v41 = vmul.f32 1.442695, %v151_v40 }
 0x197   :  { %227 = vpow2.f32 %v152_v41 }
 0x19a   :  { %v163_v42 = vpop.permute.xlu0 %162 }
 0x19b   :  { %vm164_vm4 = vcmp.eq.s32.totalorder %v37_v4, %v163_v42 }
 0x19c   :  { %v165_v45 = vsel %vm164_vm4, %v144_v35, 0.0 }
 0x19d   :  { %v166_v46 = vsel %vm147_vm3, %v165_v45, 0.0 }
 0x1a1   :  { %v228_v43 = vpop.eup %227 }
 0x1a2   :  { %v154_v44 = vsel %vm147_vm3, %v228_v43, 0.0 }
 0x1a3   :  { %155 = vadd.xlane.f32.xlu1 %v154_v44 }
 0x1a7   :  { %167 = vadd.xlane.f32.xlu1 %v166_v46 }
 0x230   :  { %v156_v47 = vpop.xlane.xlu1 %155 }
 0x231   :  { %229 = vlog2.f32 %v156_v47 }
 0x234   :  { %v168_v51 = vpop.xlane.xlu1 %167 }
 0x23b   :  { %v230_v48 = vpop.eup %229 }
 0x23c   :  { %v158_v49 = vmul.f32 0.6931472, %v230_v48 }
 0x23e   :  { %v159_v50 = vadd.f32 %v158_v49, %v150_v39 }
 0x240   :  { %v169_v52 = vsub.f32 %v159_v50, %v168_v51 }
 0x242   :  { %171 = vst.msk [vmem:[%s327_s5] sm:$0x3] %vm170_vm5, %v169_v52 }
 0x243   :  { %176 = vsyncpa [#allocation5], 1 }

</bundles_post_ra>
